<compile_context>
chip_gen: v7x
topology: tpu7x:2x2x1
jax: 0.10.0
libtpu: 0.0.40
codegen_flags: <defaults>
</compile_context>

<pallas_src>
import jax
import jax.numpy as jnp
import numpy as np
from jax.experimental import pallas as pl
from jax.experimental.pallas import tpu as pltpu

# ----- small synthetic SentConfig --------------------------------------------
VOCAB = 64          # vocab size (GloVe vocab stand-in)
EMBED = 32          # word_embeddings_size
MAX_SEN_LEN = 16    # config.max_sen_len  (L) -- power of two (see pos mask)
NUM_CH = 8          # config.cnn_num_channels (C)
KS = (3, 4, 5)      # config.cnn_kernel_size
OUT = 2             # config.output_size
BATCH = 16          # total sentences per forward call
TILE_B = 8          # sentences per grid step -> 8*16 = 128 MXU rows per push

KMAX = max(KS)                        # 5  (all conv kernels zero-padded to this)
POOL1 = MAX_SEN_LEN - KS[0] + 1       # kernel_size1 = 14
POOL3 = MAX_SEN_LEN - KS[2] + 1       # kernel_size3 = 12 (module also uses it for conv2)
C3 = 3 * NUM_CH                       # 24 fused output channels
BLT = TILE_B * MAX_SEN_LEN            # 128 rows per grid step

assert BATCH % TILE_B == 0
assert MAX_SEN_LEN & (MAX_SEN_LEN - 1) == 0  # pos mask uses `& (L-1)`


# ----- Pallas kernel ----------------------------------------------------------
def _cnn_sent_kernel(tok_ref, table_ref, wconv_ref, bconv_ref, wfc_ref, bfc_ref,
                     out_ref):
    # ---- embedding lookup fused in-kernel: one-hot (BLt, V) @ table (V, E) ----
    # bf16 x bf16 on the MXU, f32 accumulation; rows are exact bf16 table rows.
    # TODO(synk): for a real GloVe-sized vocab the table cannot live in VMEM;
    # switch to a scalar-prefetch / manual-DMA row gather with the table in HBM.
    tok = tok_ref[...]                                               # (BLt, 1) int32
    vocab_ids = jax.lax.broadcasted_iota(jnp.int32, (BLT, VOCAB), 1)
    onehot = (tok == vocab_ids).astype(jnp.bfloat16)                 # (BLt, V)
    emb = jnp.dot(onehot, table_ref[...],
                  preferred_element_type=jnp.float32)                # (BLt, E) f32

    # ---- fused 3-branch Conv1d: KMAX per-tap matmuls accumulated in f32 ----
    # Per-tap operand shifted[r] = emb[r + dt] is built in-register:
    # pltpu.roll follows jnp.roll semantics, so shift = BLT - dt == -dt moves
    # row r+dt down to row r; wrapped rows (r >= BLT - dt) are explicitly
    # zeroed (they could only land in pool-masked positions, but be explicit).
    row_e = jax.lax.broadcasted_iota(jnp.int32, (BLT, EMBED), 0)
    y = jnp.dot(emb.astype(jnp.bfloat16), wconv_ref[0],
                preferred_element_type=jnp.float32)                  # tap 0 (no shift)
    for dt in range(1, KMAX):
        shifted = pltpu.roll(emb, BLT - dt, axis=0)                  # emb[(r+dt) % BLt]
        shifted = jnp.where(row_e < BLT - dt, shifted, 0.0)          # zero wrap rows
        y = y + jnp.dot(shifted.astype(jnp.bfloat16), wconv_ref[dt],
                        preferred_element_type=jnp.float32)          # (BLt, 3C)
    y = jnp.maximum(y + bconv_ref[...], 0.0)                         # bias + ReLU (f32)

    # ---- per-branch max_pool1d fused on the 2D tile: positional/channel-group
    #      mask (conv2 reuses kernel_size3 -- module quirk), then per-sentence
    #      sublane maxes over tile-aligned 16-row slabs.  -inf sentinel is safe:
    #      every pool window keeps at least position 0 (a finite, ReLU'd value).
    r_i = jax.lax.broadcasted_iota(jnp.int32, (BLT, C3), 0)
    c_i = jax.lax.broadcasted_iota(jnp.int32, (BLT, C3), 1)
    pos = r_i & (MAX_SEN_LEN - 1)                                    # position within sentence
    limit = jnp.where(c_i < NUM_CH, POOL1, POOL3)
    y_mask = jnp.where(pos < limit, y, -jnp.inf)
    feats = jnp.concatenate(
        [jnp.max(y_mask[b * MAX_SEN_LEN:(b + 1) * MAX_SEN_LEN, :],
                 axis=0, keepdims=True)
         for b in range(TILE_B)], axis=0)                            # (TILE_B, 3C)

    # dropout: eval-mode identity
    # TODO(synk): training-mode dropout would use pltpu.prng_seed + prng_random_bits.

    # FC + softmax (f32; the 24x2 FC gains nothing from bf16, keep it exact).
    logits = jnp.dot(feats, wfc_ref[...],
                     preferred_element_type=jnp.float32) + bfc_ref[...]   # (TILE_B, OUT)
    logits = logits - jnp.max(logits, axis=1, keepdims=True)
    p = jnp.exp(logits)
    out_ref[...] = p * pl.reciprocal(jnp.sum(p, axis=1, keepdims=True), approx=True)


# ----- one-time host-side packing into the fused kernel layouts ---------------
def pack_params(cw, cb, fw, fb):
    wf = jnp.zeros((KMAX, EMBED, C3), jnp.float32)
    for i in range(3):
        # PyTorch conv weight (C, E, ks) -> (ks, E, C), zero-padded to KMAX taps,
        # placed at output-channel block i.
        wt = jnp.transpose(cw[i], (2, 1, 0)).astype(jnp.float32)
        wf = wf.at[:KS[i], :, i * NUM_CH:(i + 1) * NUM_CH].set(wt)
    w_conv = wf.astype(jnp.bfloat16)                                  # (KMAX, E, 3C) bf16
    b_conv = jnp.concatenate([b.astype(jnp.float32) for b in cb]).reshape(1, C3)
    w_fc = jnp.transpose(fw, (1, 0)).astype(jnp.float32)              # (3C, OUT) f32
    b_fc = fb.reshape(1, OUT).astype(jnp.float32)
    return w_conv, b_conv, w_fc, b_fc


@jax.jit
def cnn_sent_forward(x_tokens, emb_table_bf16, w_conv, b_conv, w_fc, b_fc):
    """x_tokens: (L, B) int. Returns (B, OUT) softmax probabilities."""
    # token ids only (tiny): seq-major -> batch-major column vector.
    tok = x_tokens.T.reshape(BATCH * MAX_SEN_LEN, 1).astype(jnp.int32)
    n_tiles = BATCH // TILE_B

    return pl.pallas_call(
        _cnn_sent_kernel,
        out_shape=jax.ShapeDtypeStruct((BATCH, OUT), jnp.float32),
        grid=(n_tiles,),                                   # batch tiles; v7x splits across TCs
        in_specs=[
            pl.BlockSpec((BLT, 1), lambda b: (b, 0)),               # token ids per tile
            pl.BlockSpec((VOCAB, EMBED), lambda b: (0, 0)),         # bf16 embedding table (4 KiB)
            pl.BlockSpec((KMAX, EMBED, C3), lambda b: (0, 0, 0)),   # fused per-tap conv weights
            pl.BlockSpec((1, C3), lambda b: (0, 0)),                # fused conv bias
            pl.BlockSpec((C3, OUT), lambda b: (0, 0)),              # fc weight
            pl.BlockSpec((1, OUT), lambda b: (0, 0)),               # fc bias
        ],
        out_specs=pl.BlockSpec((TILE_B, OUT), lambda b: (b, 0)),    # contiguous per-tile writeback
        compiler_params=pltpu.CompilerParams(
            dimension_semantics=("parallel",)),
    )(tok, emb_table_bf16, w_conv, b_conv, w_fc, b_fc)


# ----- plain-JAX f32 reference (mirrors the PyTorch forward) ------------------
def reference_forward(x_tokens, emb_table, cw, cb, fw, fb):
    e = emb_table[x_tokens]                          # (L, B, E)
    e = jnp.transpose(e, (1, 2, 0))                  # (B, E, L)  == permute(1,2,0)

    def conv1d(x, w, b):
        y = jax.lax.conv_general_dilated(
            x, w, window_strides=(1,), padding='VALID',
            dimension_numbers=('NCH', 'OIH', 'NCH'))
        return y + b[None, :, None]

    r1 = jax.nn.relu(conv1d(e, cw[0], cb[0]))
    r2 = jax.nn.relu(conv1d(e, cw[1], cb[1]))
    r3 = jax.nn.relu(conv1d(e, cw[2], cb[2]))
    o1 = jnp.max(r1[:, :, :POOL1], axis=2)
    o2 = jnp.max(r2[:, :, :POOL3], axis=2)           # module uses kernel_size3 here
    o3 = jnp.max(r3[:, :, :POOL3], axis=2)
    feats = jnp.concatenate([o1, o2, o3], axis=1)    # (B, 3C)
    logits = feats @ fw.T + fb
    return jax.nn.softmax(logits, axis=1)


# ----- main -------------------------------------------------------------------
if __name__ == "__main__":
    key = jax.random.PRNGKey(0)
    ks = jax.random.split(key, 10)

    emb_table = jax.random.normal(ks[0], (VOCAB, EMBED), jnp.float32) * 0.5
    cw = [jax.random.normal(ks[1 + i], (NUM_CH, EMBED, KS[i]), jnp.float32) * 0.1
          for i in range(3)]
    cb = [jax.random.normal(ks[4 + i], (NUM_CH,), jnp.float32) * 0.1
          for i in range(3)]
    fw = jax.random.normal(ks[7], (OUT, 3 * NUM_CH), jnp.float32) * 0.1
    fb = jax.random.normal(ks[8], (OUT,), jnp.float32) * 0.1

    x_tokens = jax.random.randint(ks[9], (MAX_SEN_LEN, BATCH), 0, VOCAB,
                                  dtype=jnp.int32)

    packed = pack_params(cw, cb, fw, fb)             # packed once, reused per call
    table_bf16 = emb_table.astype(jnp.bfloat16)      # cast once

    out = cnn_sent_forward(x_tokens, table_bf16, *packed)
    out = jax.block_until_ready(out)

    ref = reference_forward(x_tokens, emb_table, cw, cb, fw, fb)
    # bf16 table/conv weights + approx softmax reciprocal vs. an f32 reference:
    # expected deviation on the probabilities is O(1e-3); 2e-2 gives margin.
    np.testing.assert_allclose(np.asarray(out), np.asarray(ref),
                               rtol=2e-2, atol=2e-2)
    assert out.shape == (BATCH, OUT)
    print("KERNEL_OK")
</pallas_src>

<mosaic_0001>
module attributes {stable_mosaic.version = 11 : i64} {
  func.func @_cnn_sent_kernel(%arg0: i32, %arg1: memref<128x1xi32, #tpu.memory_space<vmem>>, %arg2: memref<64x32xbf16, #tpu.memory_space<vmem>>, %arg3: memref<5x32x24xbf16, #tpu.memory_space<vmem>>, %arg4: memref<1x24xf32, #tpu.memory_space<vmem>>, %arg5: memref<24x2xf32, #tpu.memory_space<vmem>>, %arg6: memref<1x2xf32, #tpu.memory_space<vmem>>, %arg7: memref<8x2xf32, #tpu.memory_space<vmem>>) attributes {dimension_semantics = [#tpu.dimension_semantics<parallel>], iteration_bounds = array<i64: 2>, scalar_prefetch = 0 : i64, scratch_operands = 0 : i64, tpu.core_type = #tpu.core_type<tc>, window_params = [{transform_indices = @transform_0, window_bounds = array<i64: 128, 1>}, {pipeline_mode = #tpu.pipeline_mode<synchronous>, transform_indices = @transform_1, window_bounds = array<i64: 64, 32>}, {pipeline_mode = #tpu.pipeline_mode<synchronous>, transform_indices = @transform_2, window_bounds = array<i64: 5, 32, 24>}, {pipeline_mode = #tpu.pipeline_mode<synchronous>, transform_indices = @transform_3, window_bounds = array<i64: 1, 24>}, {pipeline_mode = #tpu.pipeline_mode<synchronous>, transform_indices = @transform_4, window_bounds = array<i64: 24, 2>}, {pipeline_mode = #tpu.pipeline_mode<synchronous>, transform_indices = @transform_5, window_bounds = array<i64: 1, 2>}, {transform_indices = @transform_6, window_bounds = array<i64: 8, 2>}]} {
    %c0 = arith.constant 0 : index
    %c0_0 = arith.constant 0 : index
    %0 = vector.load %arg1[%c0, %c0_0] : memref<128x1xi32, #tpu.memory_space<vmem>>, vector<128x1xi32>
    %1 = tpu.iota {dimensions = array<i32: 1>} : vector<128x64xi32>
    %2 = vector.broadcast %0 : vector<128x1xi32> to vector<128x64xi32>
    %3 = arith.cmpi eq, %2, %1 : vector<128x64xi32>
    %4 = arith.extui %3 : vector<128x64xi1> to vector<128x64xi32>
    %5 = arith.sitofp %4 : vector<128x64xi32> to vector<128x64xf32>
    %6 = arith.truncf %5 : vector<128x64xf32> to vector<128x64xbf16>
    %c0_1 = arith.constant 0 : index
    %c0_2 = arith.constant 0 : index
    %7 = vector.load %arg2[%c0_1, %c0_2] : memref<64x32xbf16, #tpu.memory_space<vmem>>, vector<64x32xbf16>
    %cst = arith.constant dense<0.000000e+00> : vector<128x32xf32>
    %8 = tpu.matmul %6, %7, %cst {dimension_numbers = #tpu.dot_dimension_numbers<[1], [0], [0], [1], [0, 0, 1, 1], [], []>} : vector<128x64xbf16>, vector<64x32xbf16>, vector<128x32xf32> -> vector<128x32xf32>
    %9 = tpu.iota {dimensions = array<i32: 0>} : vector<128x32xi32>
    %10 = arith.truncf %8 : vector<128x32xf32> to vector<128x32xbf16>
    %c0_3 = arith.constant 0 : index
    %c0_4 = arith.constant 0 : index
    %c0_5 = arith.constant 0 : index
    %11 = vector.load %arg3[%c0_3, %c0_4, %c0_5] : memref<5x32x24xbf16, #tpu.memory_space<vmem>>, vector<1x32x24xbf16>
    %12 = vector.shape_cast %11 : vector<1x32x24xbf16> to vector<32x24xbf16>
    %cst_6 = arith.constant dense<0.000000e+00> : vector<128x24xf32>
    %13 = tpu.matmul %10, %12, %cst_6 {dimension_numbers = #tpu.dot_dimension_numbers<[1], [0], [0], [1], [0, 0, 1, 1], [], []>} : vector<128x32xbf16>, vector<32x24xbf16>, vector<128x24xf32> -> vector<128x24xf32>
    %c127_i32 = arith.constant 127 : i32
    %14 = tpu.dynamic_rotate %8 by %c127_i32 dim 0 : vector<128x32xf32>, i32 -> vector<128x32xf32>
    %c127_i32_7 = arith.constant 127 : i32
    %15 = vector.broadcast %c127_i32_7 : i32 to vector<128x32xi32>
    %16 = arith.cmpi slt, %9, %15 : vector<128x32xi32>
    %cst_8 = arith.constant 0.000000e+00 : f32
    %17 = vector.broadcast %cst_8 : f32 to vector<128x32xf32>
    %18 = arith.select %16, %14, %17 : vector<128x32xi1>, vector<128x32xf32>
    %19 = arith.truncf %18 : vector<128x32xf32> to vector<128x32xbf16>
    %c1 = arith.constant 1 : index
    %c0_9 = arith.constant 0 : index
    %c0_10 = arith.constant 0 : index
    %20 = vector.load %arg3[%c1, %c0_9, %c0_10] : memref<5x32x24xbf16, #tpu.memory_space<vmem>>, vector<1x32x24xbf16>
    %21 = vector.shape_cast %20 : vector<1x32x24xbf16> to vector<32x24xbf16>
    %cst_11 = arith.constant dense<0.000000e+00> : vector<128x24xf32>
    %22 = tpu.matmul %19, %21, %cst_11 {dimension_numbers = #tpu.dot_dimension_numbers<[1], [0], [0], [1], [0, 0, 1, 1], [], []>} : vector<128x32xbf16>, vector<32x24xbf16>, vector<128x24xf32> -> vector<128x24xf32>
    %23 = arith.addf %13, %22 : vector<128x24xf32>
    %c126_i32 = arith.constant 126 : i32
    %24 = tpu.dynamic_rotate %8 by %c126_i32 dim 0 : vector<128x32xf32>, i32 -> vector<128x32xf32>
    %c126_i32_12 = arith.constant 126 : i32
    %25 = vector.broadcast %c126_i32_12 : i32 to vector<128x32xi32>
    %26 = arith.cmpi slt, %9, %25 : vector<128x32xi32>
    %cst_13 = arith.constant 0.000000e+00 : f32
    %27 = vector.broadcast %cst_13 : f32 to vector<128x32xf32>
    %28 = arith.select %26, %24, %27 : vector<128x32xi1>, vector<128x32xf32>
    %29 = arith.truncf %28 : vector<128x32xf32> to vector<128x32xbf16>
    %c2 = arith.constant 2 : index
    %c0_14 = arith.constant 0 : index
    %c0_15 = arith.constant 0 : index
    %30 = vector.load %arg3[%c2, %c0_14, %c0_15] : memref<5x32x24xbf16, #tpu.memory_space<vmem>>, vector<1x32x24xbf16>
    %31 = vector.shape_cast %30 : vector<1x32x24xbf16> to vector<32x24xbf16>
    %cst_16 = arith.constant dense<0.000000e+00> : vector<128x24xf32>
    %32 = tpu.matmul %29, %31, %cst_16 {dimension_numbers = #tpu.dot_dimension_numbers<[1], [0], [0], [1], [0, 0, 1, 1], [], []>} : vector<128x32xbf16>, vector<32x24xbf16>, vector<128x24xf32> -> vector<128x24xf32>
    %33 = arith.addf %23, %32 : vector<128x24xf32>
    %c125_i32 = arith.constant 125 : i32
    %34 = tpu.dynamic_rotate %8 by %c125_i32 dim 0 : vector<128x32xf32>, i32 -> vector<128x32xf32>
    %c125_i32_17 = arith.constant 125 : i32
    %35 = vector.broadcast %c125_i32_17 : i32 to vector<128x32xi32>
    %36 = arith.cmpi slt, %9, %35 : vector<128x32xi32>
    %cst_18 = arith.constant 0.000000e+00 : f32
    %37 = vector.broadcast %cst_18 : f32 to vector<128x32xf32>
    %38 = arith.select %36, %34, %37 : vector<128x32xi1>, vector<128x32xf32>
    %39 = arith.truncf %38 : vector<128x32xf32> to vector<128x32xbf16>
    %c3 = arith.constant 3 : index
    %c0_19 = arith.constant 0 : index
    %c0_20 = arith.constant 0 : index
    %40 = vector.load %arg3[%c3, %c0_19, %c0_20] : memref<5x32x24xbf16, #tpu.memory_space<vmem>>, vector<1x32x24xbf16>
    %41 = vector.shape_cast %40 : vector<1x32x24xbf16> to vector<32x24xbf16>
    %cst_21 = arith.constant dense<0.000000e+00> : vector<128x24xf32>
    %42 = tpu.matmul %39, %41, %cst_21 {dimension_numbers = #tpu.dot_dimension_numbers<[1], [0], [0], [1], [0, 0, 1, 1], [], []>} : vector<128x32xbf16>, vector<32x24xbf16>, vector<128x24xf32> -> vector<128x24xf32>
    %43 = arith.addf %33, %42 : vector<128x24xf32>
    %c124_i32 = arith.constant 124 : i32
    %44 = tpu.dynamic_rotate %8 by %c124_i32 dim 0 : vector<128x32xf32>, i32 -> vector<128x32xf32>
    %c124_i32_22 = arith.constant 124 : i32
    %45 = vector.broadcast %c124_i32_22 : i32 to vector<128x32xi32>
    %46 = arith.cmpi slt, %9, %45 : vector<128x32xi32>
    %cst_23 = arith.constant 0.000000e+00 : f32
    %47 = vector.broadcast %cst_23 : f32 to vector<128x32xf32>
    %48 = arith.select %46, %44, %47 : vector<128x32xi1>, vector<128x32xf32>
    %49 = arith.truncf %48 : vector<128x32xf32> to vector<128x32xbf16>
    %c4 = arith.constant 4 : index
    %c0_24 = arith.constant 0 : index
    %c0_25 = arith.constant 0 : index
    %50 = vector.load %arg3[%c4, %c0_24, %c0_25] : memref<5x32x24xbf16, #tpu.memory_space<vmem>>, vector<1x32x24xbf16>
    %51 = vector.shape_cast %50 : vector<1x32x24xbf16> to vector<32x24xbf16>
    %cst_26 = arith.constant dense<0.000000e+00> : vector<128x24xf32>
    %52 = tpu.matmul %49, %51, %cst_26 {dimension_numbers = #tpu.dot_dimension_numbers<[1], [0], [0], [1], [0, 0, 1, 1], [], []>} : vector<128x32xbf16>, vector<32x24xbf16>, vector<128x24xf32> -> vector<128x24xf32>
    %53 = arith.addf %43, %52 : vector<128x24xf32>
    %c0_27 = arith.constant 0 : index
    %c0_28 = arith.constant 0 : index
    %54 = vector.load %arg4[%c0_27, %c0_28] : memref<1x24xf32, #tpu.memory_space<vmem>>, vector<1x24xf32>
    %55 = vector.broadcast %54 : vector<1x24xf32> to vector<128x24xf32>
    %56 = arith.addf %53, %55 : vector<128x24xf32>
    %cst_29 = arith.constant 0.000000e+00 : f32
    %57 = vector.broadcast %cst_29 : f32 to vector<128x24xf32>
    %58 = arith.maximumf %56, %57 : vector<128x24xf32>
    %59 = tpu.iota {dimensions = array<i32: 0>} : vector<128x24xi32>
    %60 = tpu.iota {dimensions = array<i32: 1>} : vector<128x24xi32>
    %c15_i32 = arith.constant 15 : i32
    %61 = vector.broadcast %c15_i32 : i32 to vector<128x24xi32>
    %62 = arith.andi %59, %61 : vector<128x24xi32>
    %c8_i32 = arith.constant 8 : i32
    %63 = vector.broadcast %c8_i32 : i32 to vector<128x24xi32>
    %64 = arith.cmpi slt, %60, %63 : vector<128x24xi32>
    %c14_i32 = arith.constant 14 : i32
    %c12_i32 = arith.constant 12 : i32
    %65 = vector.broadcast %c14_i32 : i32 to vector<128x24xi32>
    %66 = vector.broadcast %c12_i32 : i32 to vector<128x24xi32>
    %67 = arith.select %64, %65, %66 : vector<128x24xi1>, vector<128x24xi32>
    %68 = arith.cmpi slt, %62, %67 : vector<128x24xi32>
    %cst_30 = arith.constant 0xFF800000 : f32
    %69 = vector.broadcast %cst_30 : f32 to vector<128x24xf32>
    %70 = arith.select %68, %58, %69 : vector<128x24xi1>, vector<128x24xf32>
    %71 = vector.extract_strided_slice %70 {offsets = [0, 0], sizes = [16, 24], strides = [1, 1]} : vector<128x24xf32> to vector<16x24xf32>
    %cst_31 = arith.constant dense<0xFF800000> : vector<24xf32>
    %72 = vector.multi_reduction <maximumf>, %71, %cst_31 [0] : vector<16x24xf32> to vector<24xf32>
    %73 = vector.shape_cast %72 : vector<24xf32> to vector<1x24xf32>
    %74 = vector.extract_strided_slice %70 {offsets = [16, 0], sizes = [16, 24], strides = [1, 1]} : vector<128x24xf32> to vector<16x24xf32>
    %cst_32 = arith.constant dense<0xFF800000> : vector<24xf32>
    %75 = vector.multi_reduction <maximumf>, %74, %cst_32 [0] : vector<16x24xf32> to vector<24xf32>
    %76 = vector.shape_cast %75 : vector<24xf32> to vector<1x24xf32>
    %77 = vector.extract_strided_slice %70 {offsets = [32, 0], sizes = [16, 24], strides = [1, 1]} : vector<128x24xf32> to vector<16x24xf32>
    %cst_33 = arith.constant dense<0xFF800000> : vector<24xf32>
    %78 = vector.multi_reduction <maximumf>, %77, %cst_33 [0] : vector<16x24xf32> to vector<24xf32>
    %79 = vector.shape_cast %78 : vector<24xf32> to vector<1x24xf32>
    %80 = vector.extract_strided_slice %70 {offsets = [48, 0], sizes = [16, 24], strides = [1, 1]} : vector<128x24xf32> to vector<16x24xf32>
    %cst_34 = arith.constant dense<0xFF800000> : vector<24xf32>
    %81 = vector.multi_reduction <maximumf>, %80, %cst_34 [0] : vector<16x24xf32> to vector<24xf32>
    %82 = vector.shape_cast %81 : vector<24xf32> to vector<1x24xf32>
    %83 = vector.extract_strided_slice %70 {offsets = [64, 0], sizes = [16, 24], strides = [1, 1]} : vector<128x24xf32> to vector<16x24xf32>
    %cst_35 = arith.constant dense<0xFF800000> : vector<24xf32>
    %84 = vector.multi_reduction <maximumf>, %83, %cst_35 [0] : vector<16x24xf32> to vector<24xf32>
    %85 = vector.shape_cast %84 : vector<24xf32> to vector<1x24xf32>
    %86 = vector.extract_strided_slice %70 {offsets = [80, 0], sizes = [16, 24], strides = [1, 1]} : vector<128x24xf32> to vector<16x24xf32>
    %cst_36 = arith.constant dense<0xFF800000> : vector<24xf32>
    %87 = vector.multi_reduction <maximumf>, %86, %cst_36 [0] : vector<16x24xf32> to vector<24xf32>
    %88 = vector.shape_cast %87 : vector<24xf32> to vector<1x24xf32>
    %89 = vector.extract_strided_slice %70 {offsets = [96, 0], sizes = [16, 24], strides = [1, 1]} : vector<128x24xf32> to vector<16x24xf32>
    %cst_37 = arith.constant dense<0xFF800000> : vector<24xf32>
    %90 = vector.multi_reduction <maximumf>, %89, %cst_37 [0] : vector<16x24xf32> to vector<24xf32>
    %91 = vector.shape_cast %90 : vector<24xf32> to vector<1x24xf32>
    %92 = vector.extract_strided_slice %70 {offsets = [112, 0], sizes = [16, 24], strides = [1, 1]} : vector<128x24xf32> to vector<16x24xf32>
    %cst_38 = arith.constant dense<0xFF800000> : vector<24xf32>
    %93 = vector.multi_reduction <maximumf>, %92, %cst_38 [0] : vector<16x24xf32> to vector<24xf32>
    %94 = vector.shape_cast %93 : vector<24xf32> to vector<1x24xf32>
    %95 = tpu.concatenate %73, %76, %79, %82, %85, %88, %91, %94 in 0 : vector<1x24xf32>, vector<1x24xf32>, vector<1x24xf32>, vector<1x24xf32>, vector<1x24xf32>, vector<1x24xf32>, vector<1x24xf32>, vector<1x24xf32> -> vector<8x24xf32>
    %c0_39 = arith.constant 0 : index
    %c0_40 = arith.constant 0 : index
    %96 = vector.load %arg5[%c0_39, %c0_40] : memref<24x2xf32, #tpu.memory_space<vmem>>, vector<24x2xf32>
    %cst_41 = arith.constant dense<0.000000e+00> : vector<8x2xf32>
    %97 = tpu.matmul %95, %96, %cst_41 {dimension_numbers = #tpu.dot_dimension_numbers<[1], [0], [0], [1], [0, 0, 1, 1], [], []>} : vector<8x24xf32>, vector<24x2xf32>, vector<8x2xf32> -> vector<8x2xf32>
    %c0_42 = arith.constant 0 : index
    %c0_43 = arith.constant 0 : index
    %98 = vector.load %arg6[%c0_42, %c0_43] : memref<1x2xf32, #tpu.memory_space<vmem>>, vector<1x2xf32>
    %99 = vector.broadcast %98 : vector<1x2xf32> to vector<8x2xf32>
    %100 = arith.addf %97, %99 : vector<8x2xf32>
    %cst_44 = arith.constant dense<0xFF800000> : vector<8xf32>
    %101 = vector.multi_reduction <maximumf>, %100, %cst_44 [1] : vector<8x2xf32> to vector<8xf32>
    %102 = vector.shape_cast %101 : vector<8xf32> to vector<8x1xf32>
    %103 = vector.broadcast %102 : vector<8x1xf32> to vector<8x2xf32>
    %104 = arith.subf %100, %103 : vector<8x2xf32>
    %105 = math.exp %104 : vector<8x2xf32>
    %cst_45 = arith.constant dense<0.000000e+00> : vector<8xf32>
    %106 = vector.multi_reduction <add>, %105, %cst_45 [1] : vector<8x2xf32> to vector<8xf32>
    %107 = vector.shape_cast %106 : vector<8xf32> to vector<8x1xf32>
    %108 = tpu.reciprocal %107 {approx = true} : vector<8x1xf32> -> vector<8x1xf32>
    %109 = vector.broadcast %108 : vector<8x1xf32> to vector<8x2xf32>
    %110 = arith.mulf %105, %109 : vector<8x2xf32>
    %c0_46 = arith.constant 0 : index
    %c0_47 = arith.constant 0 : index
    %111 = vector.load %arg7[%c0_46, %c0_47] : memref<8x2xf32, #tpu.memory_space<vmem>>, vector<8x2xf32>
    tpu.vector_store %arg7[%c0_46, %c0_47], %110 {strides = array<i32>} : memref<8x2xf32, #tpu.memory_space<vmem>>, vector<8x2xf32>,
    return
  }
  func.func @transform_0(%arg0: i32) -> (i32, i32) {
    %c0_i32 = arith.constant 0 : i32
    %c0_i32_0 = arith.constant 0 : i32
    return %arg0, %c0_i32 : i32, i32
  }
  func.func @transform_1(%arg0: i32) -> (i32, i32) {
    %c0_i32 = arith.constant 0 : i32
    %c0_i32_0 = arith.constant 0 : i32
    %c0_i32_1 = arith.constant 0 : i32
    return %c0_i32, %c0_i32_0 : i32, i32
  }
  func.func @transform_2(%arg0: i32) -> (i32, i32, i32) {
    %c0_i32 = arith.constant 0 : i32
    %c0_i32_0 = arith.constant 0 : i32
    %c0_i32_1 = arith.constant 0 : i32
    %c0_i32_2 = arith.constant 0 : i32
    return %c0_i32, %c0_i32_0, %c0_i32_1 : i32, i32, i32
  }
  func.func @transform_3(%arg0: i32) -> (i32, i32) {
    %c0_i32 = arith.constant 0 : i32
    %c0_i32_0 = arith.constant 0 : i32
    %c0_i32_1 = arith.constant 0 : i32
    return %c0_i32, %c0_i32_0 : i32, i32
  }
  func.func @transform_4(%arg0: i32) -> (i32, i32) {
    %c0_i32 = arith.constant 0 : i32
    %c0_i32_0 = arith.constant 0 : i32
    %c0_i32_1 = arith.constant 0 : i32
    return %c0_i32, %c0_i32_0 : i32, i32
  }
  func.func @transform_5(%arg0: i32) -> (i32, i32) {
    %c0_i32 = arith.constant 0 : i32
    %c0_i32_0 = arith.constant 0 : i32
    %c0_i32_1 = arith.constant 0 : i32
    return %c0_i32, %c0_i32_0 : i32, i32
  }
  func.func @transform_6(%arg0: i32) -> (i32, i32) {
    %c0_i32 = arith.constant 0 : i32
    %c0_i32_0 = arith.constant 0 : i32
    return %arg0, %c0_i32 : i32, i32
  }
}

</mosaic_0001>

<bundles_post_ra>
// kernel: cnn_sent_forward.1
= control target key start
LH: loop header
LB: loop body
LE: loop exit
PB: predicated region body
PF: predicated region fallthrough
CT: control target
= control target key end

     0   :  { %s2367_s21 = smov 0   ;;  %s3184_s0 = inlined_call_operand.vmem [shape: s32[256,1], index: 0, kind: input, shape index: {}]   ;;  %s3185_s1 = inlined_call_operand.vmem [shape: bf16[64,32], index: 1, kind: input, shape index: {}]   ;;  %s3186_s2 = inlined_call_operand.vmem [shape: bf16[5,32,24], index: 2, kind: input, shape index: {}]   ;;  %s3187_s3 = inlined_call_operand.vmem [shape: f32[1,24], index: 3, kind: input, shape index: {}]   ;;  %s3188_s4 = inlined_call_operand.vmem [shape: f32[24,2], index: 4, kind: input, shape index: {}]   ;;  %s3189_s5 = inlined_call_operand.vmem [shape: f32[1,2], index: 5, kind: input, shape index: {}]   ;;  %s3190_s6 = inlined_call_operand.vmem [shape: f32[16,2], index: 6, kind: output, shape index: {}]  }
   0x1 LB: > { %s2373_s22 = sadd.s32 4294967295, %s2325_s21   ;;  %p1913_p0 = scmp.ge.s32.totalorder %s2325_s21, 1  ;;  %s2325_s21 = sphi %s2367_s21, %s16_s21  }
   0x2   : > { %p213_p1 = scmp.lt.s32.totalorder %s2325_s21, 3 }
   0x4   : > { %p214_p2 = pnand %p1913_p0, %p213_p1 }
   0x5   : > { %s1914_s23 = sshll.u32 (!%p214_p2), %s2373_s22, 4  ;;  %v2327_v0 = vmov (!%p214_p2), 0   ;;  %v2301_v1 = vld [vmem:[%s3185_s1] sm:$0xff] (!%p214_p2)   ;;  %v2302_v2 = vld [vmem:[%s3185_s1 + $0x8] sm:$0xff] (!%p214_p2)   ;;  %v2303_v9 = vld [vmem:[%s3185_s1 + $0x10] sm:$0xff] (!%p214_p2)   ;;  %v269_v21 = vlaneseq (!%p214_p2)  ;;  %vm407_vm4 = vcmask (!%p214_p2), 523264  }
   0x6   : > { %217 = sbr.rel (%p214_p2) target bundleno = 1269 (0x4f5), region = 44  ;;  %2300 = vset.pattern.permute.xlu1 (!%p214_p2), %v2327_v0  ;;  %2299 = vset.pattern.permute.xlu0 (!%p214_p2), %v2327_v0  ;;  %p243_p3 = scmp.lt.s32.totalorder (!%p214_p2), %s1914_s23, 31  ;;  %v2304_v10 = vld [vmem:[%s3185_s1 + $0x18] sm:$0xff] (!%p214_p2)   ;;  %v3191_v27 = vmov (!%p214_p2), 0.0   ;;  %v2305_v0 = vld [vmem:[%s3186_s2 + $0x10] sm:$0xff] (!%p214_p2)  }
   0x7   : > { %2082 = vmatprep.subr.bf16.mxu0 (!%p214_p2), %v2301_v1  ;;  %v2412_v22 = vand.u32 (!%p214_p2), 127, %v269_v21  ;;  %p248_p4 = scmp.lt.s32.totalorder (!%p214_p2), %s2373_s22, 1 }
   0x8   : > { %2083 = vmatpush3.bf16.msra.mxu0 (!%p214_p2), %v2301_v1  ;;  %v2306_v1 = vld [vmem:[%s3186_s2 + $0x18] sm:$0xff] (!%p214_p2)  }
   0x9   : > { %2084 = vmatprep.subr.bf16.mxu0 (!%p214_p2), %v2302_v2 }
   0xc   : > { %2085 = vmatpush3.bf16.msra.mxu0 (!%p214_p2), %v2302_v2  ;;  %v2463_v2 = vld [vmem:[%s3186_s2] sm:$0xff] (!%p214_p2)  }
   0xd   : > { %s3263_s23 = smov (!%p243_p3, %s1914_s23), 31  ;;  %2086 = vmatprep.subr.bf16.mxu0 %v2303_v9  ;;  %2218 = vmatprep.subr.bf16.mxu1 %v2463_v2  ;;  %s3265_s22 = smov (!%p248_p4, %s2373_s22), 1 }
   0xe   : > { %s1915_s28 = sshll.u32 %s3263_s23, 3  ;;  %2220 = vmatpush3.bf16.msra.mxu1 %v2463_v2  ;;  %s1916_s20 = sshll.u32 %s3265_s22, 3 }
   0xf   : > { %s2387_s7 = scalar_lea.vmem %s3184_s0, %s1915_s28  ;;  %s251_s25 = scalar_lea.vmem %s3190_s6, %s1916_s20 }
  0x10   : > { %v255_v3 = vld [vmem:[%s2387_s7 + $0x10] sm:$0xff]  ;;  %v253_v4 = vld [vmem:[%s2387_s7] sm:$0xff]  ;;  %v256_v5 = vld [vmem:[%s2387_s7 + $0x18] sm:$0xff]  ;;  %2087 = vmatpush3.bf16.msra.mxu0 %v2303_v9 }
  0x11   : > { %278 = vperm.xlu1 %2300, %v255_v3   ;;  %272 = vperm.xlu0 %2299, %v253_v4   ;;  %v254_v6 = vld [vmem:[%s2387_s7 + $0x8] sm:$0xff]  ;;  %v257_v8 = vld [vmem:[%s2387_s7 + $0x20] sm:$0xff]  ;;  %v260_v11 = vld [vmem:[%s2387_s7 + $0x38] sm:$0xff] }
  0x12   : > { %v258_v7 = vld [vmem:[%s2387_s7 + $0x28] sm:$0xff]  ;;  %v259_v12 = vld [vmem:[%s2387_s7 + $0x30] sm:$0xff]  ;;  %2088 = vmatprep.subr.bf16.mxu0 %v2304_v10  ;;  %v261_v14 = vld [vmem:[%s2387_s7 + $0x40] sm:$0xff] }
  0x13   : > { %v262_v13 = vld [vmem:[%s2387_s7 + $0x48] sm:$0xff]  ;;  %v264_v15 = vld [vmem:[%s2387_s7 + $0x58] sm:$0xff]  ;;  %v263_v16 = vld [vmem:[%s2387_s7 + $0x50] sm:$0xff] }
  0x14   : > { %2089 = vmatpush3.bf16.msra.mxu0 %v2304_v10  ;;  %v266_v17 = vld [vmem:[%s2387_s7 + $0x68] sm:$0xff]  ;;  %v265_v18 = vld [vmem:[%s2387_s7 + $0x60] sm:$0xff]  ;;  %v268_v19 = vld [vmem:[%s2387_s7 + $0x78] sm:$0xff] }
  0x15   : > { %281 = vperm.xlu1 %2300, %v256_v5   ;;  %275 = vperm.xlu0 %2299, %v254_v6   ;;  %v267_v20 = vld [vmem:[%s2387_s7 + $0x70] sm:$0xff]  ;;  %v2471_v3 = vld [vmem:[%s3186_s2 + $0x8] sm:$0xff]   ;;  %v2478_v4 = vld [vmem:[%s3186_s2 + $0x20] sm:$0xff]   ;;  %v2482_v5 = vshrl.u32 %v269_v21, 7 }
  0x16   : > { %2106 = vmatprep.subr.bf16.mxu0 %v2305_v0  ;;  %2219 = vmatprep.subr.bf16.mxu1 %v2471_v3 }
  0x17   : > { %2221 = vmatpush3.bf16.msra.mxu1 %v2471_v3 }
  0x18   : > { %2146 = vmatprep.subr.bf16.mxu1 %v2478_v4 }
  0x19   : > { %287 = vperm.xlu1 %2300, %v258_v7   ;;  %284 = vperm.xlu0 %2299, %v257_v8  }
  0x1d   : > { %293 = vperm.xlu1 %2300, %v260_v11   ;;  %290 = vperm.xlu0 %2299, %v259_v12  }
  0x21   : > { %299 = vperm.xlu1 %2300, %v262_v13   ;;  %296 = vperm.xlu0 %2299, %v261_v14  }
  0x25   : > { %305 = vperm.xlu1 %2300, %v264_v15   ;;  %302 = vperm.xlu0 %2299, %v263_v16  }
  0x29   : > { %311 = vperm.xlu1 %2300, %v266_v17   ;;  %308 = vperm.xlu0 %2299, %v265_v18  }
  0x2d   : > { %317 = vperm.xlu1 %2300, %v268_v19   ;;  %314 = vperm.xlu0 %2299, %v267_v20  }
  0x90   : > { %v279_v23 = vpop.permute.xlu1 %278  ;;  %v273_v24 = vpop.permute.xlu0 %272 }
  0x91   : > { %vm321_vm0 = vcmp.eq.s32.totalorder %v279_v23, %v2412_v22  ;;  %vm319_vm1 = vcmp.eq.s32.totalorder %v273_v24, %v2412_v22 }
  0x92   : > { %v1919_v28 = vsel %vm321_vm0, 1.0, %v3191_v27  ;;  %v1917_v29 = vsel %vm319_vm1, 1.0, %v3191_v27  ;;  %vm574_vm1 = vcmp.lt.s32.totalorder %v2482_v5, 7 }
  0x94   : > { %v282_v25 = vpop.permute.xlu1 %281  ;;  %v276_v26 = vpop.permute.xlu0 %275 }
  0x95   : > { %vm322_vm2 = vcmp.eq.s32.totalorder %v282_v25, %v2412_v22  ;;  %vm320_vm3 = vcmp.eq.s32.totalorder %v276_v26, %v2412_v22 }
  0x96   : > { %v1920_v30 = vsel %vm322_vm2, 1.0, %v3191_v27  ;;  %v1918_v31 = vsel %vm320_vm3, 1.0, %v3191_v27  ;;  %vm1146_vm2 = vcmp.lt.s32.totalorder %v2482_v5, 5  ;;  %vm1373_vm3 = vcmp.lt.s32.totalorder %v2482_v5, 4 }
  0x97   : > { %v368_v32 = vpack.c.bf16 %v1920_v30, %v1919_v28  ;;  %v367_v33 = vpack.c.bf16 %v1918_v31, %v1917_v29 }
  0x98   : > { %v288_v34 = vpop.permute.xlu1 %287  ;;  %v285_v35 = vpop.permute.xlu0 %284 }
  0x99   : > { %vm324_vm5 = vcmp.eq.s32.totalorder %v288_v34, %v2412_v22  ;;  %vm323_vm6 = vcmp.eq.s32.totalorder %v285_v35, %v2412_v22  ;;  %2090 = vmatprep.mubr.msk.bf16.mxu0 %vm407_vm4, %v367_v33 }
  0x9a   : > { %v1922_v36 = vsel %vm324_vm5, 1.0, %v3191_v27  ;;  %v1921_v37 = vsel %vm323_vm6, 1.0, %v3191_v27  ;;  %2091 = vmatmul.mubr.msk.bf16.vlgmr.msra.gmra.mrb[0].mxu0 %vm407_vm4, %v368_v32  ;;  %vm919_vm5 = vcmp.lt.s32.totalorder %v2482_v5, 6 }
  0x9b   : > { %v369_v38 = vpack.c.bf16 %v1922_v36, %v1921_v37  ;;  %2107 = vmatpush3.bf16.msra.mxu0 %v2305_v0 }
  0x9c   : > { %v294_v39 = vpop.permute.xlu1 %293  ;;  %v291_v40 = vpop.permute.xlu0 %290  ;;  %2108 = vmatprep.subr.bf16.mxu0 %v2306_v1 }
  0x9d   : > { %vm326_vm7 = vcmp.eq.s32.totalorder %v294_v39, %v2412_v22  ;;  %vm325_vm8 = vcmp.eq.s32.totalorder %v291_v40, %v2412_v22  ;;  %2094 = vmatprep.mubr.msk.bf16.mxu0 %vm407_vm4, %v369_v38 }
  0x9e   : > { %v1924_v41 = vsel %vm326_vm7, 1.0, %v3191_v27  ;;  %v1923_v42 = vsel %vm325_vm8, 1.0, %v3191_v27 }
  0x9f   : > { %v370_v43 = vpack.c.bf16 %v1924_v41, %v1923_v42  ;;  %2109 = vmatpush3.bf16.msra.mxu0 %v2306_v1 }
  0xa0   : > { %v300_v44 = vpop.permute.xlu1 %299  ;;  %v297_v45 = vpop.permute.xlu0 %296  ;;  %2126 = vmatprep.subr.bf16.mxu0 %v2463_v2 }
  0xa1   : > { %vm328_vm9 = vcmp.eq.s32.totalorder %v300_v44, %v2412_v22  ;;  %vm327_vm10 = vcmp.eq.s32.totalorder %v297_v45, %v2412_v22 }
  0xa2   : > { %v1926_v46 = vsel %vm328_vm9, 1.0, %v3191_v27  ;;  %v1925_v47 = vsel %vm327_vm10, 1.0, %v3191_v27  ;;  %2095 = vmatmul.mubr.msk.bf16.gmra.mrb[4].mxu0 %vm407_vm4, %v370_v43  ;;  %vm2330_vm10 = vmmov 0  }
  0xa3   : > { %v371_v48 = vpack.c.bf16 %v1926_v46, %v1925_v47  ;;  %v2575_v47 = vadd.s32 120, %v2482_v5 }
  0xa4   : > { %v306_v49 = vpop.permute.xlu1 %305  ;;  %v303_v50 = vpop.permute.xlu0 %302 }
  0xa5   : > { %vm330_vm11 = vcmp.eq.s32.totalorder %v306_v49, %v2412_v22  ;;  %vm329_vm12 = vcmp.eq.s32.totalorder %v303_v50, %v2412_v22  ;;  %2098 = vmatprep.mubr.msk.bf16.mxu0 %vm407_vm4, %v371_v48  ;;  %vm606_vm6 = vcmp.lt.s32.totalorder %v2575_v47, 127  ;;  %vm951_vm7 = vcmp.lt.s32.totalorder %v2575_v47, 126 }
  0xa6   : > { %v1928_v51 = vsel %vm330_vm11, 1.0, %v3191_v27  ;;  %v1927_v52 = vsel %vm329_vm12, 1.0, %v3191_v27  ;;  %vm1178_vm8 = vcmp.lt.s32.totalorder %v2575_v47, 125  ;;  %vm1405_vm9 = vcmp.lt.s32.totalorder %v2575_v47, 124 }
  0xa7   : > { %v372_v53 = vpack.c.bf16 %v1928_v51, %v1927_v52  ;;  %vm1639_vm11 = vcmp.lt.s32.totalorder %v2412_v22, 8  ;;  %vm1673_vm12 = vcmask 195584  }
  0xa8   : > { %v312_v54 = vpop.permute.xlu1 %311  ;;  %v309_v55 = vpop.permute.xlu0 %308 }
  0xa9   : > { %vm332_vm13 = vcmp.eq.s32.totalorder %v312_v54, %v2412_v22  ;;  %vm331_vm14 = vcmp.eq.s32.totalorder %v309_v55, %v2412_v22 }
  0xaa   : > { %v1930_v56 = vsel %vm332_vm13, 1.0, %v3191_v27  ;;  %v1929_v57 = vsel %vm331_vm14, 1.0, %v3191_v27  ;;  %2099 = vmatmul.mubr.msk.bf16.gmra.mrb[8].mxu0 %vm407_vm4, %v372_v53  ;;  %v2310_v53 = vld [vmem:[%s3186_s2 + $0x28] sm:$0xff]  }
  0xab   : > { %v373_v58 = vpack.c.bf16 %v1930_v56, %v1929_v57 }
  0xac   : > { %v318_v59 = vpop.permute.xlu1 %317  ;;  %v315_v60 = vpop.permute.xlu0 %314 }
  0xad   : > { %vm334_vm15 = vcmp.eq.s32.totalorder %v318_v59, %v2412_v22  ;;  %vm333_vm0 = vcmp.eq.s32.totalorder %v315_v60, %v2412_v22  ;;  %2102 = vmatprep.mubr.msk.bf16.mxu0 %vm407_vm4, %v373_v58 }
  0xae   : > { %v1932_v61 = vsel %vm334_vm15, 1.0, %v3191_v27  ;;  %v1931_v62 = vsel %vm333_vm0, 1.0, %v3191_v27 }
  0xaf   : > { %v374_v63 = vpack.c.bf16 %v1932_v61, %v1931_v62 }
  0xb2   : > { %2103 = vmatmul.mubr.msk.bf16.gmra.mrb[12].mxu0 %vm407_vm4, %v374_v63  ;;  %vm648_vm4 = vcmask 261120  }
 0x16d   : > { %v2485_v6 = vpop.f32.mrb[0].mxu0 }
 0x16e   : > { %v560_v7 = vrot.slane %v2485_v6, 1  ;;  %v905_v8 = vrot.slane %v2485_v6, 2  ;;  %v1132_v9 = vrot.slane %v2485_v6, 3  ;;  %v1359_v10 = vrot.slane %v2485_v6, 4  ;;  %v2494_v11 = vpop.f32.mrb[1].mxu0 }
 0x16f   : > { %v558_v12 = vrot.slane %v2494_v11, 1  ;;  %v3197_v13 = vrot.slane %v2494_v11, 2  ;;  %v3195_v14 = vrot.slane %v2494_v11, 3  ;;  %v3193_v15 = vrot.slane %v2494_v11, 4  ;;  %v2500_v16 = vpop.f32.mrb[2].mxu0 }
 0x170   : > { %v561_v18 = vrot.slane %v2500_v16, 1  ;;  %v906_v19 = vrot.slane %v2500_v16, 2  ;;  %v1133_v20 = vrot.slane %v2500_v16, 3  ;;  %v2507_v21 = vpop.f32.mrb[3].mxu0  ;;  %v1360_v23 = vrot.slane %v2500_v16, 4 }
 0x171   : > { %v559_v24 = vrot.slane %v2507_v21, 1  ;;  %v904_v25 = vrot.slane %v2507_v21, 2  ;;  %v1131_v26 = vrot.slane %v2507_v21, 3  ;;  %v1358_v30 = vrot.slane %v2507_v21, 4 }
 0x172   : > { %v587_v28 = vsel %vm574_vm1, %v560_v7, %v561_v18  ;;  %v2517_v29 = vsel %vm1146_vm2, %v1132_v9, %v1133_v20  ;;  %v2522_v31 = vsel %vm919_vm5, %v905_v8, %v906_v19  ;;  %v2526_v32 = vsel %vm1373_vm3, %v1359_v10, %v1360_v23 }
 0x173   : > { %v588_v33 = vsel %vm574_vm1, %v559_v24, %v560_v7  ;;  %v589_v34 = vsel %vm574_vm1, %v558_v12, %v559_v24  ;;  %v2536_v35 = vsel %vm919_vm5, %v904_v25, %v905_v8  ;;  %v2542_v37 = vsel %vm919_vm5, %v3197_v13, %v904_v25 }
 0x174   : > { %v623_v36 = vpack.c.bf16 %v588_v33, %v589_v34  ;;  %v2548_v39 = vsel %vm1146_vm2, %v1131_v26, %v1132_v9  ;;  %v968_v41 = vpack.c.bf16 %v2536_v35, %v2542_v37  ;;  %v2558_v42 = vsel %vm1146_vm2, %v3195_v14, %v1131_v26 }
 0x175   : > { %v2550_v40 = vpop.f32.mrb[4].mxu0  ;;  %v2562_v43 = vsel %vm1373_vm3, %v1358_v30, %v1359_v10  ;;  %v2568_v44 = vsel %vm1373_vm3, %v3193_v15, %v1358_v30 }
 0x176   : > { %v564_v45 = vrot.slane %v2550_v40, 1  ;;  %v2571_v46 = vpop.f32.mrb[5].mxu0  ;;  %2110 = vmatprep.mubr.msk.bf16.mxu0 %vm648_vm4, %v623_v36  ;;  %v909_v48 = vrot.slane %v2550_v40, 2  ;;  %v3214_v37 = vrot.slane %v2550_v40, 4 }
 0x177   : > { %v562_v49 = vrot.slane %v2571_v46, 1  ;;  %v3196_v50 = vrot.slane %v2571_v46, 3  ;;  %v3194_v51 = vrot.slane %v2571_v46, 4  ;;  %v2581_v52 = vpop.f32.mrb[6].mxu0  ;;  %v907_v54 = vrot.slane %v2571_v46, 2 }
 0x178   : > { %v565_v55 = vrot.slane %v2581_v52, 1  ;;  %v910_v56 = vrot.slane %v2581_v52, 2  ;;  %v2587_v57 = vpop.f32.mrb[7].mxu0 }
 0x179   : > { %v586_v58 = vsel %vm574_vm1, %v561_v18, %v562_v49  ;;  %v2595_v59 = vsel %vm1146_vm2, %v1133_v20, %v3196_v50  ;;  %v2601_v60 = vsel %vm1373_vm3, %v1360_v23, %v3194_v51  ;;  %v563_v61 = vrot.slane %v2587_v57, 1 }
 0x17a   : > { %v624_v62 = vpack.c.bf16 %v586_v58, %v587_v28  ;;  %v908_v1 = vrot.slane %v2587_v57, 2  ;;  %v583_v20 = vsel %vm574_vm1, %v564_v45, %v565_v55  ;;  %v2620_v23 = vsel %vm919_vm5, %v906_v19, %v907_v54 }
 0x17b   : > { %v584_v9 = vsel %vm574_vm1, %v563_v61, %v564_v45  ;;  %v585_v10 = vsel %vm574_vm1, %v562_v49, %v563_v61  ;;  %v2637_v30 = vsel %vm919_vm5, %v909_v48, %v910_v56 }
 0x17c   : > { %2111 = vmatmul.mubr.msk.bf16.vlgmr.msra.gmra.mrb[16].mxu0 %vm648_vm4, %v624_v62  ;;  %v625_v18 = vpack.c.bf16 %v584_v9, %v585_v10  ;;  %v2624_v24 = vsel %vm919_vm5, %v908_v1, %v909_v48  ;;  %v2633_v28 = vsel %vm919_vm5, %v907_v54, %v908_v1 }
 0x17d   : > { %v2626_v25 = vpop.f32.mrb[8].mxu0  ;;  %2127 = vmatpush3.bf16.msra.mxu0 %v2463_v2 }
 0x17e   : > { %v568_v45 = vrot.slane %v2626_v25, 1  ;;  %v2645_v2 = vpop.f32.mrb[9].mxu0  ;;  %2114 = vmatprep.mubr.msk.bf16.mxu0 %vm648_vm4, %v625_v18  ;;  %2128 = vmatprep.subr.bf16.mxu0 %v2471_v3  ;;  %v913_v48 = vrot.slane %v2626_v25, 2 }
 0x17f   : > { %v566_v54 = vrot.slane %v2645_v2, 1  ;;  %v911_v58 = vrot.slane %v2645_v2, 2  ;;  %v2653_v61 = vpop.f32.mrb[10].mxu0 }
 0x180   : > { %v569_v10 = vrot.slane %v2653_v61, 1  ;;  %v2659_v18 = vpop.f32.mrb[11].mxu0  ;;  %v914_v27 = vrot.slane %v2653_v61, 2 }
 0x181   : > { %v567_v63 = vrot.slane %v2659_v18, 1  ;;  %v912_v19 = vrot.slane %v2659_v18, 2  ;;  %2129 = vmatpush3.bf16.msra.mxu0 %v2471_v3  ;;  %v582_v17 = vsel %vm574_vm1, %v565_v55, %v566_v54  ;;  %v2675_v38 = vsel %vm919_vm5, %v910_v56, %v911_v58 }
 0x182   : > { %v579_v15 = vsel %vm574_vm1, %v568_v45, %v569_v10  ;;  %v626_v33 = vpack.c.bf16 %v582_v17, %v583_v20  ;;  %v2701_v20 = vsel %vm919_vm5, %v913_v48, %v914_v27 }
 0x183   : > { %v580_v9 = vsel %vm574_vm1, %v567_v63, %v568_v45  ;;  %v581_v3 = vsel %vm574_vm1, %v566_v54, %v567_v63  ;;  %v2685_v51 = vsel %vm919_vm5, %v912_v19, %v913_v48  ;;  %v2689_v62 = vsel %vm919_vm5, %v911_v58, %v912_v19 }
 0x184   : > { %v627_v26 = vpack.c.bf16 %v580_v9, %v581_v3  ;;  %2115 = vmatmul.mubr.msk.bf16.gmra.mrb[20].mxu0 %vm648_vm4, %v626_v33  ;;  %v1139_v58 = vrot.slane %v2659_v18, 3 }
 0x185   : > { %v2695_v56 = vpop.f32.mrb[12].mxu0 }
 0x186   : > { %v572_v9 = vrot.slane %v2695_v56, 1  ;;  %v2711_v3 = vpop.f32.mrb[13].mxu0  ;;  %2118 = vmatprep.mubr.msk.bf16.mxu0 %vm648_vm4, %v627_v26  ;;  %v917_v48 = vrot.slane %v2695_v56, 2 }
 0x187   : > { %v570_v19 = vrot.slane %v2711_v3, 1  ;;  %v915_v45 = vrot.slane %v2711_v3, 2  ;;  %v2718_v63 = vpop.f32.mrb[14].mxu0  ;;  %v1142_v55 = vrot.slane %v2711_v3, 3 }
 0x188   : > { %v573_v33 = vrot.slane %v2718_v63, 1  ;;  %v918_v36 = vrot.slane %v2718_v63, 2  ;;  %v2724_v7 = vpop.f32.mrb[15].mxu0  ;;  %v1145_v26 = vrot.slane %v2718_v63, 3  ;;  %v553_v8 = vpack.c.bf16 %v2718_v63, %v2695_v56 }
 0x189   : > { %v571_v17 = vrot.slane %v2724_v7, 1  ;;  %v916_v0 = vrot.slane %v2724_v7, 2  ;;  %v552_v49 = vpack.c.bf16 %v2724_v7, %v2711_v3  ;;  %v578_v54 = vsel %vm574_vm1, %v569_v10, %v570_v19 }
 0x18a   : > { %v575_v1 = vsel %vm574_vm1, %v572_v9, %v573_v33  ;;  %v628_v50 = vpack.c.bf16 %v578_v54, %v579_v15  ;;  %v590_v10 = vsel %vm574_vm1, %v573_v33, %v558_v12  ;;  %v2755_v54 = vsel %vm919_vm5, %v914_v27, %v915_v45 }
 0x18b   : > { %v576_v14 = vsel %vm574_vm1, %v571_v17, %v572_v9  ;;  %v577_v34 = vsel %vm574_vm1, %v570_v19, %v571_v17  ;;  %2142 = vmatprep.mubr.msk.bf16.mxu1 %vm648_vm4, %v552_v49  ;;  %v622_v15 = vsel %vm606_vm6, %v590_v10, 0.0  ;;  %v2759_v17 = vsel %vm919_vm5, %v916_v0, %v917_v48 }
 0x18c   : > { %v629_v13 = vpack.c.bf16 %v576_v14, %v577_v34  ;;  %v1143_v19 = vrot.slane %v2724_v7, 3  ;;  %2119 = vmatmul.mubr.msk.bf16.gmra.mrb[24].mxu0 %vm648_vm4, %v628_v50  ;;  %2143 = vmatmul.mubr.msk.bf16.vlgmr.msra.gmra.mrb[0].mxu1 %vm648_vm4, %v553_v8  ;;  %v630_v12 = vpack.c.bf16 %v622_v15, %v575_v1  ;;  %v973_v14 = vpack.c.bf16 %v2755_v54, %v2701_v20 }
 0x18d   : > { %v2768_v34 = vsel %vm919_vm5, %v915_v45, %v916_v0  ;;  %v1370_v27 = vrot.slane %v2724_v7, 4  ;;  %2147 = vmatpush3.bf16.msra.mxu1 %v2478_v4  ;;  %2150 = vmatprep.mubr.msk.bf16.mxu1 %vm648_vm4, %v968_v41  ;;  %v2780_v8 = vsel %vm919_vm5, %v917_v48, %v918_v36  ;;  %v3198_v49 = vrot.slane %v2494_v11, 2  ;;  %v2311_v4 = vld [vmem:[%s3186_s2 + $0x30] sm:$0xff]  }
 0x18e   : > { %v974_v50 = vpack.c.bf16 %v2759_v17, %v2768_v34  ;;  %2122 = vmatprep.mubr.msk.bf16.mxu0 %vm648_vm4, %v629_v13  ;;  %2148 = vmatprep.subr.bf16.mxu1 %v2310_v53  ;;  %v3199_v41 = vrot.slane %v2550_v40, 3  ;;  %v3200_v7 = vrot.slane %v2587_v57, 3  ;;  %v3202_v1 = vrot.slane %v2571_v46, 3 }
 0x18f   : > { %v935_v0 = vsel %vm919_vm5, %v918_v36, %v3198_v49  ;;  %v3203_v48 = vrot.slane %v2645_v2, 3  ;;  %v3204_v10 = vrot.slane %v2581_v52, 3  ;;  %vm1746_vm1 = vcmask 1040384  }
 0x190   : > { %v2792_v35 = vsel %vm951_vm7, %v935_v0, 0.0  ;;  %v2802_v36 = vsel %vm1146_vm2, %v3200_v7, %v3199_v41  ;;  %v3201_v13 = vmov %v3200_v7  ;;  %v3206_v0 = vmov %v3199_v41 }
 0x191   : > { %v2810_v45 = vsel %vm1146_vm2, %v3202_v1, %v3201_v13  ;;  %v975_v33 = vpack.c.bf16 %v2792_v35, %v2780_v8  ;;  %v2822_v15 = vsel %vm1146_vm2, %v3204_v10, %v3203_v48  ;;  %v3205_v49 = vmov %v3204_v10  ;;  %2149 = vmatpush3.bf16.msra.mxu1 %v2310_v53  ;;  %v2312_v53 = vld [vmem:[%s3186_s2 + $0x38] sm:$0xff]  }
 0x192   : > { %v2830_v41 = vsel %vm1146_vm2, %v3206_v0, %v3205_v49  ;;  %v3207_v35 = vrot.slane %v2626_v25, 3  ;;  %v3208_v13 = vmov %v3203_v48  ;;  %v3209_v48 = vrot.slane %v2653_v61, 3  ;;  %2166 = vmatprep.subr.bf16.mxu1 %v2311_v4 }
 0x193   : > { %v2844_v1 = vsel %vm1146_vm2, %v3208_v13, %v1139_v58  ;;  %vm1750_vm7 = vcmask 1042432  }
 0x194   : > { %v2838_v7 = vsel %vm1146_vm2, %v1139_v58, %v3207_v35  ;;  %v2850_v10 = vsel %vm1146_vm2, %v3209_v48, %v1142_v55  ;;  %v3210_v0 = vmov %v3209_v48  ;;  %v3211_v58 = vrot.slane %v2695_v56, 3  ;;  %2123 = vmatmul.mubr.msk.bf16.gmra.mrb[28].mxu0 %vm648_vm4, %v630_v12 }
 0x195   : > { %v1199_v49 = vpack.c.bf16 %v2838_v7, %v2844_v1  ;;  %v1151_v8 = vsel %vm1146_vm2, %v3207_v35, %v3210_v0  ;;  %v1149_v48 = vsel %vm1146_vm2, %v1142_v55, %v1143_v19  ;;  %v3213_v35 = vrot.slane %v2494_v11, 3 }
 0x196   : > { %v1148_v13 = vsel %vm1146_vm2, %v1143_v19, %v3211_v58  ;;  %v1200_v7 = vpack.c.bf16 %v2850_v10, %v1151_v8  ;;  %v3212_v9 = vmov %v3211_v58  ;;  %v1422_v19 = vpack.c.bf16 %v2562_v43, %v2568_v44 }
 0x197   : > { %v1201_v1 = vpack.c.bf16 %v1148_v13, %v1149_v48  ;;  %v1147_v0 = vsel %vm1146_vm2, %v3212_v9, %v1145_v26  ;;  %v1162_v58 = vsel %vm1146_vm2, %v1145_v26, %v3213_v35  ;;  %v3215_v8 = vrot.slane %v2587_v57, 4 }
 0x198   : > { %v1194_v55 = vsel %vm1178_vm8, %v1162_v58, 0.0  ;;  %v3217_v13 = vrot.slane %v2571_v46, 4  ;;  %v3218_v48 = vpack.c.bf16 %v2620_v23, %v2522_v31  ;;  %v3219_v35 = vrot.slane %v2645_v2, 4 }
 0x199   : > { %v1383_v10 = vsel %vm1373_vm3, %v3215_v8, %v3214_v37  ;;  %v3216_v9 = vmov %v3215_v8  ;;  %v1202_v43 = vpack.c.bf16 %v1194_v55, %v1147_v0  ;;  %v3220_v37 = vrot.slane %v2581_v52, 4 }
 0x19a   : > { %v1384_v26 = vsel %vm1373_vm3, %v3217_v13, %v3216_v9  ;;  %2151 = vmatmul.mubr.msk.bf16.vlgmr.msra.gmra.mrb[4].mxu1 %vm648_vm4, %v3218_v48  ;;  %v1371_v8 = vrot.slane %v2695_v56, 4  ;;  %v3221_v12 = vpack.c.bf16 %v2507_v21, %v2494_v11  ;;  %v3223_v23 = vrot.slane %v2550_v40, 4 }
 0x19b   : > { %v1424_v44 = vpack.c.bf16 %v1383_v10, %v1384_v26  ;;  %v1381_v58 = vsel %vm1373_vm3, %v3220_v37, %v3219_v35  ;;  %2167 = vmatpush3.bf16.msra.mxu1 %v2311_v4  ;;  %v3222_v31 = vmov %v3220_v37  ;;  %v3224_v55 = vrot.slane %v2626_v25, 4  ;;  %v2313_v26 = vld [vmem:[%s3186_s2 + $0x40] sm:$0xff]  }
 0x19c   : > { %2130 = vmatprep.mubr.msk.bf16.mxu0 %vm648_vm4, %v3221_v12  ;;  %v1382_v0 = vsel %vm1373_vm3, %v3223_v23, %v3222_v31  ;;  %v3225_v10 = vrot.slane %v2659_v18, 4  ;;  %v3227_v21 = vmov %v3219_v35  ;;  %v3228_v13 = vpack.c.bf16 %v2624_v24, %v2633_v28  ;;  %2168 = vmatprep.subr.bf16.mxu1 %v2312_v53 }
 0x19d   : > { %v1425_v48 = vpack.c.bf16 %v1381_v58, %v1382_v0  ;;  %v3229_v37 = vrot.slane %v2711_v3, 4  ;;  %v3230_v12 = vrot.slane %v2653_v61, 4  ;;  %v3232_v28 = vmov %v3224_v55 }
 0x19e   : > { %v1379_v56 = vsel %vm1373_vm3, %v3225_v10, %v3224_v55  ;;  %v3226_v4 = vmov %v3225_v10  ;;  %2154 = vmatprep.mubr.msk.bf16.mxu1 %vm648_vm4, %v3228_v13  ;;  %v1375_v58 = vsel %vm1373_vm3, %v1370_v27, %v1371_v8  ;;  %v3234_v10 = vrot.slane %v2718_v63, 4 }
 0x19f   : > { %v1380_v9 = vsel %vm1373_vm3, %v3227_v21, %v3226_v4  ;;  %v1377_v31 = vsel %vm1373_vm3, %v3230_v12, %v3229_v37  ;;  %v3231_v24 = vmov %v3230_v12  ;;  %v3233_v0 = vmov %v3229_v37  ;;  %2169 = vmatpush3.bf16.msra.mxu1 %v2312_v53 }
 0x1a0   : > { %v1426_v35 = vpack.c.bf16 %v1379_v56, %v1380_v9  ;;  %v1378_v23 = vsel %vm1373_vm3, %v3232_v28, %v3231_v24  ;;  %v1376_v55 = vsel %vm1373_vm3, %v3233_v0, %v1370_v27  ;;  %v1374_v56 = vsel %vm1373_vm3, %v1371_v8, %v3234_v10  ;;  %2186 = vmatprep.subr.bf16.mxu1 %v2313_v26 }
 0x1a1   : > { %v1427_v4 = vpack.c.bf16 %v1377_v31, %v1378_v23  ;;  %v1428_v21 = vpack.c.bf16 %v1375_v58, %v1376_v55  ;;  %v3235_v9 = vrot.slane %v2494_v11, 4  ;;  %v3236_v13 = vmov %v3234_v10 }
 0x1a2   : > { %v3237_v27 = vpack.c.bf16 %v2500_v16, %v2485_v6  ;;  %v3238_v8 = vpack.c.bf16 %v2675_v38, %v2637_v30  ;;  %v3239_v11 = vpack.c.bf16 %v2587_v57, %v2571_v46  ;;  %v3240_v63 = vpack.c.bf16 %v2685_v51, %v2689_v62  ;;  %v2314_v46 = vld [vmem:[%s3186_s2 + $0x48] sm:$0xff]  }
 0x1a3   : > { %v1389_v37 = vsel %vm1373_vm3, %v3236_v13, %v3235_v9  ;;  %v3241_v6 = vpack.c.bf16 %v2581_v52, %v2550_v40  ;;  %v3242_v16 = vpack.c.bf16 %v2659_v18, %v2645_v2  ;;  %v3243_v38 = vpack.c.bf16 %v2653_v61, %v2626_v25  ;;  %v1762_v25 = vld [vmem:[%s3188_s4 + $0x10] sm:$0xff] }
 0x1a4   : > { %v1421_v12 = vsel %vm1405_vm9, %v1389_v37, 0.0  ;;  %2131 = vmatmul.mubr.msk.bf16.vlgmr.msra.gmra.mrb[16].mxu0 %vm648_vm4, %v3237_v27  ;;  %2155 = vmatmul.mubr.msk.bf16.gmra.mrb[8].mxu1 %vm648_vm4, %v3238_v8  ;;  %v3244_v40 = vpack.c.bf16 %v2548_v39, %v2558_v42  ;;  %v3245_v51 = vpack.c.bf16 %v2595_v59, %v2517_v29  ;;  %v3246_v52 = vpack.c.bf16 %v2802_v36, %v2810_v45  ;;  %v1760_v42 = vld [vmem:[%s3188_s4] sm:$0xff] }
 0x1a5   : > { %v1429_v3 = vpack.c.bf16 %v1421_v12, %v1374_v56  ;;  %2134 = vmatprep.mubr.msk.bf16.mxu0 %vm648_vm4, %v3239_v11  ;;  %2158 = vmatprep.mubr.msk.bf16.mxu1 %vm648_vm4, %v3240_v63  ;;  %v3247_v39 = vpack.c.bf16 %v2822_v15, %v2830_v41  ;;  %v3248_v29 = vpack.c.bf16 %v2601_v60, %v2526_v32  ;;  %v1761_v32 = vld [vmem:[%s3188_s4 + $0x8] sm:$0xff]  ;;  %v2329_v57 = vmov 0.0|0.0  }
 0x1a6   : > { %2215 = vmatprep.subr.bf16.mxu0 %v2329_v57  ;;  %v2216_v59 = vpack.c.bf16 %v1761_v32, %v1760_v42  ;;  %v3249_v60 = vmov 0.0   ;;  %v531_v53 = vadd.s32 8, %v2482_v5  ;;  %v537_v58 = vadd.s32 56, %v2482_v5 }
 0x1a7   : > { %v535_v10 = vadd.s32 40, %v2482_v5  ;;  %v541_v56 = vadd.s32 88, %v2482_v5  ;;  %vm1752_vm8 = vcmask 1043456   ;;  %vm1754_vm9 = vcmask 1044480  }
 0x1a8   : > { %2217 = vmatpush3.bf16.msra.mxu0 %v2216_v59  ;;  %v1624_v23 = vand.u32 15, %v531_v53  ;;  %v1630_v27 = vand.u32 15, %v537_v58 }
 0x1a9   : > { %2210 = vmatprep.subr.mxu0 %v3249_v60  ;;  %v1628_v8 = vand.u32 15, %v535_v10  ;;  %v1634_v11 = vand.u32 15, %v541_v56 }
 0x1ac   : > { %2135 = vmatmul.mubr.msk.bf16.gmra.mrb[20].mxu0 %vm648_vm4, %v3241_v6  ;;  %2159 = vmatmul.mubr.msk.bf16.gmra.mrb[12].mxu1 %vm648_vm4, %v973_v14 }
 0x1ad   : > { %2138 = vmatprep.mubr.msk.bf16.mxu0 %vm648_vm4, %v3242_v16  ;;  %2162 = vmatprep.mubr.msk.bf16.mxu1 %vm648_vm4, %v974_v50 }
 0x1ae   : > { %2211 = vmatpush3.msra.mxu0 %v1762_v25 }
 0x1b4   : > { %2139 = vmatmul.mubr.msk.bf16.gmra.mrb[24].mxu0 %vm648_vm4, %v3243_v38  ;;  %2163 = vmatmul.mubr.msk.bf16.gmra.mrb[0].mxu1 %vm648_vm4, %v975_v33 }
 0x1b5   : > { %2170 = vmatprep.mubr.msk.bf16.mxu1 %vm648_vm4, %v3244_v40  ;;  %2212 = vmatprep.mubr.msk.f32.mxu0 %vm2330_vm10, %v3249_v60  ;;  %v539_v40 = vadd.s32 72, %v2482_v5  ;;  %vm1756_vm10 = vcmask 1045504  }
 0x1bc   : > { %2171 = vmatmul.mubr.msk.bf16.vlgmr.msra.gmra.mrb[4].mxu1 %vm648_vm4, %v3245_v51 }
 0x1bd   : > { %2187 = vmatpush3.bf16.msra.mxu1 %v2313_v26  ;;  %2174 = vmatprep.mubr.msk.bf16.mxu1 %vm648_vm4, %v3246_v52 }
 0x1be   : > { %2188 = vmatprep.subr.bf16.mxu1 %v2314_v46 }
 0x1c1   : > { %2189 = vmatpush3.bf16.msra.mxu1 %v2314_v46 }
 0x1c4   : > { %2175 = vmatmul.mubr.msk.bf16.gmra.mrb[8].mxu1 %vm648_vm4, %v3247_v39 }
 0x1c5   : > { %2178 = vmatprep.mubr.msk.bf16.mxu1 %vm648_vm4, %v1199_v49  ;;  %v533_v49 = vadd.s32 24, %v2482_v5 }
 0x1cc   : > { %2179 = vmatmul.mubr.msk.bf16.gmra.mrb[12].mxu1 %vm648_vm4, %v1200_v7 }
 0x1cd   : > { %2182 = vmatprep.mubr.msk.bf16.mxu1 %vm648_vm4, %v1201_v1  ;;  %v3068_v1 = vld [vmem:[%s3187_s3] ss:$0 sm:$0xff] }
 0x1d4   : > { %2183 = vmatmul.mubr.msk.bf16.gmra.mrb[0].mxu1 %vm648_vm4, %v1202_v43 }
 0x1d5   : > { %2190 = vmatprep.mubr.msk.bf16.mxu1 %vm648_vm4, %v1422_v19 }
 0x1dc   : > { %2191 = vmatmul.mubr.msk.bf16.vlgmr.msra.gmra.mrb[4].mxu1 %vm648_vm4, %v3248_v29 }
 0x1dd   : > { %2194 = vmatprep.mubr.msk.bf16.mxu1 %vm648_vm4, %v1424_v44 }
 0x1e4   : > { %2195 = vmatmul.mubr.msk.bf16.gmra.mrb[8].mxu1 %vm648_vm4, %v1425_v48  ;;  %v1626_v48 = vand.u32 15, %v533_v49 }
 0x1e5   : > { %2198 = vmatprep.mubr.msk.bf16.mxu1 %vm648_vm4, %v1426_v35  ;;  %v2331_v35 = vmov 12  }
 0x1e6   : > { %v3070_v31 = vsel %vm1639_vm11, 14, %v2331_v35  ;;  %vm1758_vm11 = vcmask 1046528  }
 0x1e7   : > { %vm1644_vm13 = vcmp.lt.s32.totalorder %v1626_v48, %v3070_v31  ;;  %vm1642_vm14 = vcmp.lt.s32.totalorder %v1624_v23, %v3070_v31  ;;  %vm3090_vm15 = vcmp.lt.s32.totalorder %v1630_v27, %v3070_v31  ;;  %vm3096_vm0 = vcmp.lt.s32.totalorder %v1628_v8, %v3070_v31 }
 0x1e8   : > { %vm3101_vm2 = vcmp.lt.s32.totalorder %v1634_v11, %v3070_v31 }
 0x1ec   : > { %2199 = vmatmul.mubr.msk.bf16.gmra.mrb[12].mxu1 %vm648_vm4, %v1427_v4 }
 0x1ed   : > { %2202 = vmatprep.mubr.msk.bf16.mxu1 %vm648_vm4, %v1428_v21 }
 0x1f4   : > { %2203 = vmatmul.mubr.msk.bf16.gmra.mrb[0].mxu1 %vm648_vm4, %v1429_v3  ;;  %vm1748_vm4 = vcmask 1041408  }
 0x267   : > { %v3046_v30 = vpop.f32.mrb[28].mxu0 }
 0x268   : > { %v3048_v2 = vpop.f32.mrb[29].mxu0 }
 0x269   : > { %v3050_v61 = vpop.f32.mrb[30].mxu0 }
 0x26a   : > { %v3052_v62 = vpop.f32.mrb[31].mxu0 }
 0x277   : > { %v2132_v18 = vpop.f32.mrb[16].mxu0 }
 0x278   : > { %v840_v20 = vpop.f32.mrb[17].mxu0 }
 0x279   : > { %v2133_v54 = vpop.f32.mrb[18].mxu0 }
 0x27a   : > { %v843_v17 = vpop.f32.mrb[19].mxu0 }
 0x27f   : > { %v2136_v14 = vpop.f32.mrb[20].mxu0 }
 0x280   : > { %v856_v34 = vpop.f32.mrb[21].mxu0 }
 0x281   : > { %v2137_v50 = vpop.f32.mrb[22].mxu0 }
 0x282   : > { %v859_v36 = vpop.f32.mrb[23].mxu0 }
 0x287   : > { %v3054_v45 = vpop.f32.mrb[24].mxu0 }
 0x288   : > { %v3056_v33 = vpop.f32.mrb[25].mxu0 }
 0x289   : > { %v3058_v15 = vpop.f32.mrb[26].mxu0 }
 0x28a   : > { %v3060_v41 = vpop.f32.mrb[27].mxu0 }
 0x2af   : > { %v2192_v7 = vpop.f32.mrb[4].mxu1 }
 0x2b0   : > { %v2222_v19 = vadd.f32 %v2192_v7, %v2132_v18  ;;  %v1505_v43 = vpop.f32.mrb[5].mxu1 }
 0x2b1   : > { %v2223_v44 = vadd.f32 %v1505_v43, %v840_v20  ;;  %v2193_v26 = vpop.f32.mrb[6].mxu1 }
 0x2b2   : > { %v1593_v24 = vadd.f32 %v2222_v19, %v3068_v1  ;;  %v2224_v28 = vadd.f32 %v2193_v26, %v2133_v54  ;;  %v1508_v22 = vpop.f32.mrb[7].mxu1  ;;  %v1638_v26 = vand.u32 15, %v2575_v47 }
 0x2b3   : > { %v1591_v0 = vadd.f32 %v2223_v44, %v3068_v1  ;;  %v2225_v55 = vadd.f32 %v1508_v22, %v843_v17  ;;  %v1632_v44 = vand.u32 15, %v539_v40  ;;  %v3108_v22 = vadd.s32 104, %v2482_v5 }
 0x2b4   : > { %v1609_v4 = vmax.f32 %v1593_v24, 0.0  ;;  %v1594_v21 = vadd.f32 %v2224_v28, %v3068_v1  ;;  %vm3148_vm5 = vcmp.lt.s32.totalorder %v1638_v26, %v3070_v31 }
 0x2b5   : > { %v1607_v9 = vmax.f32 %v1591_v0, 0.0  ;;  %v1592_v13 = vadd.f32 %v2225_v55, %v3068_v1  ;;  %vm3125_vm3 = vcmp.lt.s32.totalorder %v1632_v44, %v3070_v31 }
 0x2b6   : > { %v1610_v37 = vmax.f32 %v1594_v21, 0.0  ;;  %v1683_v63 = vsel %vm1673_vm12, %v1609_v4, -inf }
 0x2b7   : > { %v1608_v12 = vmax.f32 %v1592_v13, 0.0  ;;  %v2196_v3 = vpop.f32.mrb[8].mxu1  ;;  %v1674_v46 = vsel %vm1673_vm12, %v1607_v9, -inf }
 0x2b8   : > { %v1660_v6 = vsel %vm1644_vm13, %v1610_v37, -inf  ;;  %v2226_v16 = vadd.f32 %v2196_v3, %v2136_v14  ;;  %v1521_v38 = vpop.f32.mrb[9].mxu1  ;;  %vm1843_vm13 = vcmask 15360  }
 0x2b9   : > { %v1684_v51 = vsel %vm1673_vm12, %v1660_v6, -inf  ;;  %v1658_v52 = vsel %vm1642_vm14, %v1608_v12, -inf  ;;  %v2227_v39 = vadd.f32 %v1521_v38, %v856_v34  ;;  %v2197_v29 = vpop.f32.mrb[10].mxu1 }
 0x2ba   : > { %v1685_v42 = vmax.f32 %v1683_v63, %v1684_v51  ;;  %v1675_v32 = vsel %vm1673_vm12, %v1658_v52, -inf  ;;  %v1597_v57 = vadd.f32 %v2226_v16, %v3068_v1  ;;  %v2228_v59 = vadd.f32 %v2197_v29, %v2137_v50  ;;  %v1524_v60 = vpop.f32.mrb[11].mxu1 }
 0x2bb   : > { %v1676_v25 = vmax.f32 %v1674_v46, %v1675_v32  ;;  %v1595_v18 = vadd.f32 %v2227_v39, %v3068_v1  ;;  %v2229_v20 = vadd.f32 %v1524_v60, %v859_v36 }
 0x2bc   : > { %v1686_v54 = vrot.slane %v1685_v42, 4  ;;  %v1613_v17 = vmax.f32 %v1597_v57, 0.0  ;;  %v1598_v14 = vadd.f32 %v2228_v59, %v3068_v1 }
 0x2bd   : > { %v1677_v34 = vrot.slane %v1676_v25, 4  ;;  %v1611_v53 = vmax.f32 %v1595_v18, 0.0  ;;  %v1596_v7 = vadd.f32 %v2229_v20, %v3068_v1 }
 0x2be   : > { %v1687_v19 = vmax.f32 %v1685_v42, %v1686_v54  ;;  %v1614_v36 = vmax.f32 %v1598_v14, 0.0  ;;  %v1701_v35 = vsel %vm1673_vm12, %v1613_v17, -inf }
 0x2bf   : > { %v1678_v48 = vmax.f32 %v1676_v25, %v1677_v34  ;;  %v1612_v24 = vmax.f32 %v1596_v7, 0.0  ;;  %v2200_v28 = vpop.f32.mrb[12].mxu1  ;;  %v1692_v58 = vsel %vm1673_vm12, %v1611_v53, -inf }
 0x2c0   : > { %v1688_v23 = vrot.slane %v1687_v19, 2  ;;  %v1664_v0 = vsel %vm3090_vm15, %v1614_v36, -inf  ;;  %v2230_v55 = vadd.f32 %v2200_v28, %v3054_v45  ;;  %v1537_v10 = vpop.f32.mrb[13].mxu1 }
 0x2c1   : > { %v1679_v56 = vrot.slane %v1678_v48, 2  ;;  %v1702_v4 = vsel %vm1673_vm12, %v1664_v0, -inf  ;;  %v1662_v21 = vsel %vm3096_vm0, %v1612_v24, -inf  ;;  %v2231_v9 = vadd.f32 %v1537_v10, %v3056_v33  ;;  %v2201_v13 = vpop.f32.mrb[14].mxu1 }
 0x2c2   : > { %v1689_v5 = vmax.f32 %v1687_v19, %v1688_v23  ;;  %v1703_v37 = vmax.f32 %v1701_v35, %v1702_v4  ;;  %v1693_v12 = vsel %vm1673_vm12, %v1662_v21, -inf  ;;  %v1601_v3 = vadd.f32 %v2230_v55, %v3068_v1  ;;  %v1540_v27 = vpop.f32.mrb[15].mxu1 }
 0x2c3   : > { %v1680_v8 = vmax.f32 %v1678_v48, %v1679_v56  ;;  %v1694_v11 = vmax.f32 %v1692_v58, %v1693_v12  ;;  %v1599_v45 = vadd.f32 %v2231_v9, %v3068_v1  ;;  %v2232_v63 = vadd.f32 %v2201_v13, %v3058_v15 }
 0x2c4   : > { %v1690_v6 = vrot.slane %v1689_v5, 1  ;;  %v1704_v16 = vrot.slane %v1703_v37, 4  ;;  %v1617_v38 = vmax.f32 %v1601_v3, 0.0  ;;  %v2233_v40 = vadd.f32 %v1540_v27, %v3060_v41 }
 0x2c5   : > { %v1681_v33 = vrot.slane %v1680_v8, 1  ;;  %v1695_v46 = vrot.slane %v1694_v11, 4  ;;  %v1602_v51 = vadd.f32 %v2232_v63, %v3068_v1  ;;  %v1615_v42 = vmax.f32 %v1599_v45, 0.0 }
 0x2c6   : > { %v1691_v39 = vmax.f32 %v1689_v5, %v1690_v6  ;;  %v1705_v29 = vmax.f32 %v1703_v37, %v1704_v16  ;;  %v1600_v15 = vadd.f32 %v2233_v40, %v3068_v1  ;;  %v1636_v41 = vand.u32 15, %v3108_v22 }
 0x2c7   : > { %v1682_v32 = vmax.f32 %v1680_v8, %v1681_v33  ;;  %v1696_v57 = vmax.f32 %v1694_v11, %v1695_v46  ;;  %v1618_v59 = vmax.f32 %v1602_v51, 0.0  ;;  %v2204_v60 = vpop.f32.mrb[0].mxu1  ;;  %v1719_v18 = vsel %vm1673_vm12, %v1617_v38, -inf }
 0x2c8   : > { %v1706_v25 = vrot.slane %v1705_v29, 2  ;;  %v1616_v20 = vmax.f32 %v1600_v15, 0.0  ;;  %v2234_v54 = vadd.f32 %v2204_v60, %v3046_v30  ;;  %v1553_v17 = vpop.f32.mrb[1].mxu1  ;;  %v1710_v19 = vsel %vm1673_vm12, %v1615_v42, -inf }
 0x2c9   : > { %v1747_v14 = vsel %vm1746_vm1, %v1682_v32, %v1691_v39  ;;  %v1697_v49 = vrot.slane %v1696_v57, 2  ;;  %v1668_v34 = vsel %vm3101_vm2, %v1618_v59, -inf  ;;  %v2235_v53 = vadd.f32 %v1553_v17, %v3048_v2  ;;  %v2205_v7 = vpop.f32.mrb[2].mxu1 }
 0x2ca   : > { %v1707_v50 = vmax.f32 %v1705_v29, %v1706_v25  ;;  %v1720_v36 = vsel %vm1673_vm12, %v1668_v34, -inf  ;;  %v1666_v44 = vsel %vm3125_vm3, %v1616_v20, -inf  ;;  %v1556_v48 = vpop.f32.mrb[3].mxu1  ;;  %v1605_v28 = vadd.f32 %v2234_v54, %v3068_v1 }
 0x2cb   : > { %v1698_v30 = vmax.f32 %v1696_v57, %v1697_v49  ;;  %v1721_v35 = vmax.f32 %v1719_v18, %v1720_v36  ;;  %v1711_v24 = vsel %vm1673_vm12, %v1666_v44, -inf  ;;  %v1603_v2 = vadd.f32 %v2235_v53, %v3068_v1 }
 0x2cc   : > { %v1708_v43 = vrot.slane %v1707_v50, 1  ;;  %v1712_v22 = vmax.f32 %v1710_v19, %v1711_v24  ;;  %v2236_v23 = vadd.f32 %v2205_v7, %v3050_v61  ;;  %v2237_v10 = vadd.f32 %v1556_v48, %v3052_v62  ;;  %v2012_v7 = vld [vmem:[%s3189_s5] ss:$0 sm:$0xff] }
 0x2cd   : > { %v1699_v58 = vrot.slane %v1698_v30, 1  ;;  %v1722_v0 = vrot.slane %v1721_v35, 4  ;;  %vm3155_vm6 = vcmp.lt.s32.totalorder %v1636_v41, %v3070_v31  ;;  %v1621_v13 = vmax.f32 %v1605_v28, 0.0 }
 0x2ce   : > { %v1713_v56 = vrot.slane %v1712_v22, 4  ;;  %v1606_v4 = vadd.f32 %v2236_v23, %v3068_v1  ;;  %v1604_v47 = vadd.f32 %v2237_v10, %v3068_v1  ;;  %v1709_v26 = vmax.f32 %v1707_v50, %v1708_v43 }
 0x2cf   : > { %v1700_v61 = vmax.f32 %v1698_v30, %v1699_v58  ;;  %v1723_v9 = vmax.f32 %v1721_v35, %v1722_v0  ;;  %v1619_v37 = vmax.f32 %v1603_v2, 0.0  ;;  %v1737_v63 = vsel %vm1673_vm12, %v1621_v13, -inf }
 0x2d0   : > { %v1714_v5 = vmax.f32 %v1712_v22, %v1713_v56  ;;  %v1622_v12 = vmax.f32 %v1606_v4, 0.0  ;;  %v1620_v27 = vmax.f32 %v1604_v47, 0.0 }
 0x2d1   : > { %v1749_v62 = vsel %vm1748_vm4, %v1747_v14, %v1700_v61  ;;  %v1724_v3 = vrot.slane %v1723_v9, 2  ;;  %v1728_v38 = vsel %vm1673_vm12, %v1619_v37, -inf }
 0x2d2   : > { %v1715_v8 = vrot.slane %v1714_v5, 2  ;;  %v1672_v31 = vsel %vm3148_vm5, %v1622_v12, -inf  ;;  %v1751_v11 = vsel %vm1750_vm7, %v1749_v62, %v1709_v26  ;;  %v1670_v1 = vsel %vm3155_vm6, %v1620_v27, -inf }
 0x2d3   : > { %v1725_v45 = vmax.f32 %v1723_v9, %v1724_v3  ;;  %v1738_v6 = vsel %vm1673_vm12, %v1672_v31, -inf  ;;  %v1729_v33 = vsel %vm1673_vm12, %v1670_v1, -inf }
 0x2d4   : > { %v1716_v16 = vmax.f32 %v1714_v5, %v1715_v8  ;;  %v1739_v40 = vmax.f32 %v1737_v63, %v1738_v6  ;;  %v1730_v51 = vmax.f32 %v1728_v38, %v1729_v33 }
 0x2d5   : > { %v1726_v46 = vrot.slane %v1725_v45, 1 }
 0x2d6   : > { %v1717_v52 = vrot.slane %v1716_v16, 1  ;;  %v1740_v39 = vrot.slane %v1739_v40, 4  ;;  %v1731_v29 = vrot.slane %v1730_v51, 4 }
 0x2d7   : > { %v1727_v32 = vmax.f32 %v1725_v45, %v1726_v46 }
 0x2d8   : > { %v1718_v42 = vmax.f32 %v1716_v16, %v1717_v52  ;;  %v1741_v15 = vmax.f32 %v1739_v40, %v1740_v39  ;;  %v1732_v57 = vmax.f32 %v1730_v51, %v1731_v29 }
 0x2da   : > { %v1742_v59 = vrot.slane %v1741_v15, 2  ;;  %v1753_v60 = vsel %vm1752_vm8, %v1751_v11, %v1718_v42  ;;  %v1733_v41 = vrot.slane %v1732_v57, 2 }
 0x2db   : > { %v1755_v25 = vsel %vm1754_vm9, %v1753_v60, %v1727_v32 }
 0x2dc   : > { %v1743_v18 = vmax.f32 %v1741_v15, %v1742_v59  ;;  %v1734_v20 = vmax.f32 %v1732_v57, %v1733_v41 }
 0x2de   : > { %v1744_v54 = vrot.slane %v1743_v18, 1  ;;  %v1735_v17 = vrot.slane %v1734_v20, 1 }
 0x2e0   : > { %v1736_v14 = vmax.f32 %v1734_v20, %v1735_v17  ;;  %v1745_v49 = vmax.f32 %v1743_v18, %v1744_v54 }
 0x2e2   : > { %v1757_v34 = vsel %vm1756_vm10, %v1755_v25, %v1736_v14 }
 0x2e3   : > { %v1759_v53 = vsel %vm1758_vm11, %v1757_v34, %v1745_v49 }
 0x2e4   : > { %2213 = vmatmul.mubr.msk.f32.vlgmr.msra.gmra.mrb[32].mxu0 %vm1673_vm12, %v1759_v53 }
 0x3b7   : > { %v1839_v50 = vpop.f32.mrb[32].mxu0 }
 0x3b8   : > { %v1840_v19 = vadd.f32 %v2012_v7, %v1839_v50  ;;  %v2214_v36 = vpop.f32.mrb[33].mxu0 }
 0x3ba   : > { %v1844_v44 = vsel %vm1843_vm13, %v1840_v19, -inf }
 0x3bb   : > { %1845 = vmax.xlane.f32.xlu0 %v1844_v44 }
 0x448   : > { %v1846_v48 = vpop.xlane.xlu0 %1845 }
 0x449   : > { %v1847_v30 = vsub.f32 %v1840_v19, %v1846_v48 }
 0x44b   : > { %v1848_v35 = vmul.f32 1.442695, %v1847_v30 }
 0x44d   : > { %2315 = vpow2.f32 %v1848_v35 }
 0x457   : > { %v2316_v24 = vpop.eup %2315 }
 0x458   : > { %v1850_v28 = vsel %vm1843_vm13, %v2316_v24, 0.0 }
 0x459   : > { %1851 = vadd.xlane.f32.xlu1 %v1850_v28 }
 0x4e6   : > { %v1852_v43 = vpop.xlane.xlu1 %1851 }
 0x4e7   : > { %2317 = vrcp.f32 %v1852_v43 }
 0x4f1   : > { %v2318_v22 = vpop.eup %2317 }
 0x4f2   : > { %v1854_v2 = vmul.f32 %v2318_v22, %v2316_v24 }
 0x4f4   : > { %1855 = vst.msk [vmem:[%s251_s25] sm:$0xff] %vm1843_vm13, %v1854_v2 }
 0x4f5 PF: > { %s16_s21 = sadd.s32 1, %s2325_s21  }
 0x4f6   : > { %p13_p5 = scmp.ge.s32.totalorder %s16_s21, 4  }
 0x4f8   :  { %15 = sbr.rel (!%p13_p5) target bundleno = 1 (0x1), region = 78 }

</bundles_post_ra>
